<compile_context>
chip_gen: v7x
topology: tpu7x:2x2x1
jax: 0.10.0
libtpu: 0.0.40
codegen_flags: <defaults>
</compile_context>

<pallas_src>
import functools

import jax
import jax.numpy as jnp
from jax import lax
from jax.experimental import pallas as pl
from jax.experimental.pallas import tpu as pltpu

# ----------------------- small synthetic RoBERTa config -----------------------
VOCAB = 100
MAX_POS = 64
TYPE_VOCAB = 1
HIDDEN = 32
HEADS = 4
HEAD_DIM = HIDDEN // HEADS
INTERMEDIATE = 64
LAYERS = 2
NUM_LABELS = 2
PAD_ID = 1          # roberta padding_idx
LN_EPS = 1e-5


# ------------------------------ in-kernel helpers ------------------------------
def _ln(x, g, b, eps):
    mean = jnp.mean(x, axis=-1, keepdims=True)
    var = jnp.mean(jnp.square(x - mean), axis=-1, keepdims=True)
    return (x - mean) * lax.rsqrt(var + eps) * g + b


def _gelu(x):  # exact (erf) gelu, as in HF roberta
    return 0.5 * x * (1.0 + lax.erf(x * (1.0 / jnp.sqrt(2.0))))


# ------------------------------ Pallas kernels --------------------------------
def _layernorm_kernel(x_ref, g_ref, b_ref, o_ref, *, eps):
    x = x_ref[...].astype(jnp.float32)
    o_ref[...] = _ln(x, g_ref[...], b_ref[...], eps).astype(o_ref.dtype)


def layernorm(x, g, b, eps=LN_EPS):
    """x:(M,H), g/b:(1,H) — single-block LayerNorm (embeddings only)."""
    M, H = x.shape
    return pl.pallas_call(
        functools.partial(_layernorm_kernel, eps=eps),
        out_shape=jax.ShapeDtypeStruct((M, H), x.dtype),
        grid=(1,),
        in_specs=[
            pl.BlockSpec((M, H), lambda i: (0, 0)),
            pl.BlockSpec((1, H), lambda i: (0, 0)),
            pl.BlockSpec((1, H), lambda i: (0, 0)),
        ],
        out_specs=pl.BlockSpec((M, H), lambda i: (0, 0)),
    )(x, g, b)


def _encoder_layer_kernel(x_ref, m_ref,
                          wqkv_ref, bqkv_ref, wo_ref, bo_ref,
                          ln1_g_ref, ln1_b_ref,
                          wi_ref, bi_ref, wd_ref, bd_ref,
                          ln2_g_ref, ln2_b_ref,
                          o_ref, *, heads, head_dim, eps):
    """One full RoBERTa encoder layer for a single batch element, fully fused.

    Activations (S, H) keep hidden on the lane axis; heads are handled via
    static sublane/lane slices so no head_dim=8 lane layouts or relayouts
    ever hit HBM.  All weights (~20 KB) + activations live in VMEM.
    """
    x = x_ref[0].astype(jnp.float32)          # (S, H)
    mask = m_ref[0].astype(jnp.float32)       # (1, S) additive, f32

    H = x.shape[-1]

    # --- fused QKV projection: one MXU matmul with N = 3*H lanes ---
    qkv = jnp.dot(x, wqkv_ref[...], preferred_element_type=jnp.float32)
    qkv = qkv + bqkv_ref[...]
    q = qkv[:, :H]
    k = qkv[:, H:2 * H]
    v = qkv[:, 2 * H:]

    # --- per-head attention; context folded straight into output projection ---
    scale = 1.0 / (head_dim ** 0.5)
    wo = wo_ref[...]                          # (H, H)
    attn = bo_ref[...]                        # (1, H), broadcasts over S
    for h in range(heads):                    # static unroll (heads == 4)
        sl = slice(h * head_dim, (h + 1) * head_dim)
        qh = q[:, sl] * scale
        kh = k[:, sl]
        vh = v[:, sl]
        s = jnp.dot(qh, kh.T, preferred_element_type=jnp.float32)   # (S, S)
        s = s + mask                                                 # f32 mask add
        s = s - jnp.max(s, axis=-1, keepdims=True)
        p = jnp.exp(s)
        p = p * pl.reciprocal(jnp.sum(p, axis=-1, keepdims=True), approx=True)
        ctx_h = jnp.dot(p, vh, preferred_element_type=jnp.float32)   # (S, D)
        # ctx @ wo  ==  sum_h ctx_h @ wo[h*D:(h+1)*D, :]  (no concat needed)
        attn = attn + jnp.dot(ctx_h, wo[sl, :],
                              preferred_element_type=jnp.float32)    # (S, H)

    # --- residual + LayerNorm 1 (post-LN, as in roberta) ---
    h1 = _ln(attn + x, ln1_g_ref[...], ln1_b_ref[...], eps)

    # --- FFN: gelu(h1 @ wi + bi) @ wd + bd ---
    inter = jnp.dot(h1, wi_ref[...], preferred_element_type=jnp.float32)
    inter = _gelu(inter + bi_ref[...])
    ffn = jnp.dot(inter, wd_ref[...], preferred_element_type=jnp.float32)
    ffn = ffn + bd_ref[...]

    # --- residual + LayerNorm 2 ---
    h2 = _ln(ffn + h1, ln2_g_ref[...], ln2_b_ref[...], eps)
    o_ref[0] = h2.astype(o_ref.dtype)


def encoder_layer(h, add_mask, p):
    """h: (B, S, H); add_mask: (B, 1, S) additive f32 mask."""
    B, S, H = h.shape
    I = p["wi"].shape[1]

    def w_spec(shape):
        return pl.BlockSpec(shape, lambda b: (0, 0))

    return pl.pallas_call(
        functools.partial(_encoder_layer_kernel,
                          heads=HEADS, head_dim=HEAD_DIM, eps=LN_EPS),
        out_shape=jax.ShapeDtypeStruct((B, S, H), h.dtype),
        grid=(B,),
        in_specs=[
            pl.BlockSpec((1, S, H), lambda b: (b, 0, 0)),   # x
            pl.BlockSpec((1, 1, S), lambda b: (b, 0, 0)),   # additive mask
            w_spec((H, 3 * H)),                             # wqkv
            w_spec((1, 3 * H)),                             # bqkv
            w_spec((H, H)),                                 # wo
            w_spec((1, H)),                                 # bo
            w_spec((1, H)), w_spec((1, H)),                 # ln1 g, b
            w_spec((H, I)),                                 # wi
            w_spec((1, I)),                                 # bi
            w_spec((I, H)),                                 # wd
            w_spec((1, H)),                                 # bd
            w_spec((1, H)), w_spec((1, H)),                 # ln2 g, b
        ],
        out_specs=pl.BlockSpec((1, S, H), lambda b: (b, 0, 0)),
        compiler_params=pltpu.CompilerParams(
            dimension_semantics=("parallel",)),             # v7x: 2 TCs share batch
    )(h, add_mask,
      p["wqkv"], p["bqkv"], p["wo"], p["bo"],
      p["ln1_g"], p["ln1_b"],
      p["wi"], p["bi"], p["wd"], p["bd"],
      p["ln2_g"], p["ln2_b"])


def _cls_head_kernel(x_ref, w1_ref, b1_ref, w2_ref, b2_ref, o_ref):
    x = x_ref[...].astype(jnp.float32)
    hc = jnp.tanh(jnp.dot(x, w1_ref[...], preferred_element_type=jnp.float32)
                  + b1_ref[...])
    logits = jnp.dot(hc, w2_ref[...], preferred_element_type=jnp.float32) + b2_ref[...]
    o_ref[...] = logits.astype(o_ref.dtype)


def classification_head(cls, w1, b1, w2, b2):
    """RobertaClassificationHead fused into a single kernel: tanh(cls@w1+b1)@w2+b2."""
    B, H = cls.shape
    N = w2.shape[1]
    return pl.pallas_call(
        _cls_head_kernel,
        out_shape=jax.ShapeDtypeStruct((B, N), cls.dtype),
        grid=(1,),
        in_specs=[
            pl.BlockSpec((B, H), lambda i: (0, 0)),
            pl.BlockSpec((H, H), lambda i: (0, 0)),
            pl.BlockSpec((1, H), lambda i: (0, 0)),
            pl.BlockSpec((H, N), lambda i: (0, 0)),
            pl.BlockSpec((1, N), lambda i: (0, 0)),
        ],
        out_specs=pl.BlockSpec((B, N), lambda i: (0, 0)),
    )(cls, w1, b1, w2, b2)


# ------------------------------ model (glue) -----------------------------------
def roberta_forward(params, input_ids, attention_mask, labels=None):
    B, S = input_ids.shape

    # RoBERTa position ids: cumsum over non-pad tokens, offset by padding_idx.
    pos_mask = (input_ids != PAD_ID).astype(jnp.int32)
    position_ids = jnp.cumsum(pos_mask, axis=1) * pos_mask + PAD_ID

    we = jnp.take(params["word_emb"], input_ids, axis=0)
    pe = jnp.take(params["pos_emb"], position_ids, axis=0)
    te = jnp.take(params["type_emb"], jnp.zeros_like(input_ids), axis=0)
    h = (we + pe + te).astype(jnp.float32)
    h = layernorm(h.reshape(B * S, HIDDEN),
                  params["emb_ln_g"], params["emb_ln_b"]).reshape(B, S, HIDDEN)

    # extended attention mask: 0 where attended, large negative where masked (f32)
    add_mask = ((1.0 - attention_mask.astype(jnp.float32)) * -1e9).reshape(B, 1, S)

    for layer_p in params["layers"]:
        h = encoder_layer(h, add_mask, layer_p)

    # RobertaClassificationHead: take <s> token, dense+tanh, out_proj — one kernel
    cls = h[:, 0, :]
    logits = classification_head(cls, params["cls_w"], params["cls_b"],
                                 params["out_w"], params["out_b"])

    if labels is None:
        return (logits,)
    # CrossEntropyLoss (mean reduction), plain-JAX glue
    logp = jax.nn.log_softmax(logits.astype(jnp.float32), axis=-1)
    loss = -jnp.mean(jnp.take_along_axis(logp, labels[:, None], axis=1))
    return (loss, logits)


# ------------------------------ parameter init ---------------------------------
def init_params(key):
    keys = iter(jax.random.split(key, 128))

    def nrm(shape):
        return jax.random.normal(next(keys), shape, jnp.float32) * 0.02

    params = {
        "word_emb": nrm((VOCAB, HIDDEN)),
        "pos_emb": nrm((MAX_POS, HIDDEN)),
        "type_emb": nrm((TYPE_VOCAB, HIDDEN)),
        "emb_ln_g": jnp.ones((1, HIDDEN), jnp.float32),
        "emb_ln_b": jnp.zeros((1, HIDDEN), jnp.float32),
        "layers": [],
        "cls_w": nrm((HIDDEN, HIDDEN)),
        "cls_b": jnp.zeros((1, HIDDEN), jnp.float32),
        "out_w": nrm((HIDDEN, NUM_LABELS)),
        "out_b": jnp.zeros((1, NUM_LABELS), jnp.float32),
    }
    for _ in range(LAYERS):
        params["layers"].append({
            # Q/K/V stored pre-fused: one (H, 3H) weight, one (1, 3H) bias.
            "wqkv": nrm((HIDDEN, 3 * HIDDEN)),
            "bqkv": jnp.zeros((1, 3 * HIDDEN), jnp.float32),
            "wo": nrm((HIDDEN, HIDDEN)),
            "bo": jnp.zeros((1, HIDDEN), jnp.float32),
            "ln1_g": jnp.ones((1, HIDDEN), jnp.float32),
            "ln1_b": jnp.zeros((1, HIDDEN), jnp.float32),
            "wi": nrm((HIDDEN, INTERMEDIATE)),
            "bi": jnp.zeros((1, INTERMEDIATE), jnp.float32),
            "wd": nrm((INTERMEDIATE, HIDDEN)),
            "bd": jnp.zeros((1, HIDDEN), jnp.float32),
            "ln2_g": jnp.ones((1, HIDDEN), jnp.float32),
            "ln2_b": jnp.zeros((1, HIDDEN), jnp.float32),
        })
    return params


# ----------------------------------- main ---------------------------------------
if __name__ == "__main__":
    key = jax.random.PRNGKey(0)
    k_param, k_ids, k_lbl = jax.random.split(key, 3)

    B, S = 2, 8
    params = init_params(k_param)

    input_ids = jax.random.randint(k_ids, (B, S), 2, VOCAB, dtype=jnp.int32)
    # make the tail of the second sequence padding
    input_ids = input_ids.at[1, 6:].set(PAD_ID)
    attention_mask = (input_ids != PAD_ID).astype(jnp.int32)
    labels = jax.random.randint(k_lbl, (B,), 0, NUM_LABELS, dtype=jnp.int32)

    # TODO(synk): tokenizer / pretrained-checkpoint loading and requires_grad
    # freezing have no kernel-level equivalent; only the forward math is implemented.
    fwd = jax.jit(roberta_forward)
    loss, logits = fwd(params, input_ids, attention_mask, labels)
    jax.block_until_ready((loss, logits))
    assert logits.shape == (B, NUM_LABELS)
    print("KERNEL_OK")
</pallas_src>

<mosaic_0001>
module attributes {stable_mosaic.version = 11 : i64} {
  func.func @_layernorm_kernel(%arg0: i32, %arg1: memref<16x32xf32, #tpu.memory_space<vmem>>, %arg2: memref<1x32xf32, #tpu.memory_space<vmem>>, %arg3: memref<1x32xf32, #tpu.memory_space<vmem>>, %arg4: memref<16x32xf32, #tpu.memory_space<vmem>>) attributes {dimension_semantics = [#tpu.dimension_semantics<arbitrary>], iteration_bounds = array<i64: 1>, scalar_prefetch = 0 : i64, scratch_operands = 0 : i64, tpu.core_type = #tpu.core_type<tc>, window_params = [{pipeline_mode = #tpu.pipeline_mode<synchronous>, transform_indices = @transform_0, window_bounds = array<i64: 16, 32>}, {pipeline_mode = #tpu.pipeline_mode<synchronous>, transform_indices = @transform_1, window_bounds = array<i64: 1, 32>}, {pipeline_mode = #tpu.pipeline_mode<synchronous>, transform_indices = @transform_2, window_bounds = array<i64: 1, 32>}, {pipeline_mode = #tpu.pipeline_mode<synchronous>, transform_indices = @transform_3, window_bounds = array<i64: 16, 32>}]} {
    %c0 = arith.constant 0 : index
    %c0_0 = arith.constant 0 : index
    %0 = vector.load %arg1[%c0, %c0_0] : memref<16x32xf32, #tpu.memory_space<vmem>>, vector<16x32xf32>
    %c0_1 = arith.constant 0 : index
    %c0_2 = arith.constant 0 : index
    %1 = vector.load %arg2[%c0_1, %c0_2] : memref<1x32xf32, #tpu.memory_space<vmem>>, vector<1x32xf32>
    %c0_3 = arith.constant 0 : index
    %c0_4 = arith.constant 0 : index
    %2 = vector.load %arg3[%c0_3, %c0_4] : memref<1x32xf32, #tpu.memory_space<vmem>>, vector<1x32xf32>
    %cst = arith.constant dense<0.000000e+00> : vector<16xf32>
    %3 = vector.multi_reduction <add>, %0, %cst [1] : vector<16x32xf32> to vector<16xf32>
    %4 = vector.shape_cast %3 : vector<16xf32> to vector<16x1xf32>
    %cst_5 = arith.constant 3.200000e+01 : f32
    %5 = vector.broadcast %cst_5 : f32 to vector<16x1xf32>
    %6 = arith.divf %4, %5 : vector<16x1xf32>
    %7 = vector.broadcast %6 : vector<16x1xf32> to vector<16x32xf32>
    %8 = arith.subf %0, %7 : vector<16x32xf32>
    %9 = arith.mulf %8, %8 : vector<16x32xf32>
    %cst_6 = arith.constant dense<0.000000e+00> : vector<16xf32>
    %10 = vector.multi_reduction <add>, %9, %cst_6 [1] : vector<16x32xf32> to vector<16xf32>
    %11 = vector.shape_cast %10 : vector<16xf32> to vector<16x1xf32>
    %cst_7 = arith.constant 3.200000e+01 : f32
    %12 = vector.broadcast %cst_7 : f32 to vector<16x1xf32>
    %13 = arith.divf %11, %12 : vector<16x1xf32>
    %14 = vector.broadcast %6 : vector<16x1xf32> to vector<16x32xf32>
    %15 = arith.subf %0, %14 : vector<16x32xf32>
    %cst_8 = arith.constant 9.99999974E-6 : f32
    %16 = vector.broadcast %cst_8 : f32 to vector<16x1xf32>
    %17 = arith.addf %13, %16 : vector<16x1xf32>
    %18 = math.rsqrt %17 : vector<16x1xf32>
    %19 = vector.broadcast %18 : vector<16x1xf32> to vector<16x32xf32>
    %20 = arith.mulf %15, %19 : vector<16x32xf32>
    %21 = vector.broadcast %1 : vector<1x32xf32> to vector<16x32xf32>
    %22 = arith.mulf %20, %21 : vector<16x32xf32>
    %23 = vector.broadcast %2 : vector<1x32xf32> to vector<16x32xf32>
    %24 = arith.addf %22, %23 : vector<16x32xf32>
    %c0_9 = arith.constant 0 : index
    %c0_10 = arith.constant 0 : index
    %25 = vector.load %arg4[%c0_9, %c0_10] : memref<16x32xf32, #tpu.memory_space<vmem>>, vector<16x32xf32>
    tpu.vector_store %arg4[%c0_9, %c0_10], %24 {strides = array<i32>} : memref<16x32xf32, #tpu.memory_space<vmem>>, vector<16x32xf32>,
    return
  }
  func.func @transform_0(%arg0: i32) -> (i32, i32) {
    %c0_i32 = arith.constant 0 : i32
    %c0_i32_0 = arith.constant 0 : i32
    %c0_i32_1 = arith.constant 0 : i32
    return %c0_i32, %c0_i32_0 : i32, i32
  }
  func.func @transform_1(%arg0: i32) -> (i32, i32) {
    %c0_i32 = arith.constant 0 : i32
    %c0_i32_0 = arith.constant 0 : i32
    %c0_i32_1 = arith.constant 0 : i32
    return %c0_i32, %c0_i32_0 : i32, i32
  }
  func.func @transform_2(%arg0: i32) -> (i32, i32) {
    %c0_i32 = arith.constant 0 : i32
    %c0_i32_0 = arith.constant 0 : i32
    %c0_i32_1 = arith.constant 0 : i32
    return %c0_i32, %c0_i32_0 : i32, i32
  }
  func.func @transform_3(%arg0: i32) -> (i32, i32) {
    %c0_i32 = arith.constant 0 : i32
    %c0_i32_0 = arith.constant 0 : i32
    %c0_i32_1 = arith.constant 0 : i32
    return %c0_i32, %c0_i32_0 : i32, i32
  }
}

module attributes {stable_mosaic.version = 11 : i64} {
  func.func @_cls_head_kernel(%arg0: i32, %arg1: memref<2x32xf32, #tpu.memory_space<vmem>>, %arg2: memref<32x32xf32, #tpu.memory_space<vmem>>, %arg3: memref<1x32xf32, #tpu.memory_space<vmem>>, %arg4: memref<32x2xf32, #tpu.memory_space<vmem>>, %arg5: memref<1x2xf32, #tpu.memory_space<vmem>>, %arg6: memref<2x2xf32, #tpu.memory_space<vmem>>) attributes {dimension_semantics = [#tpu.dimension_semantics<arbitrary>], iteration_bounds = array<i64: 1>, scalar_prefetch = 0 : i64, scratch_operands = 0 : i64, tpu.core_type = #tpu.core_type<tc>, window_params = [{pipeline_mode = #tpu.pipeline_mode<synchronous>, transform_indices = @transform_0, window_bounds = array<i64: 2, 32>}, {pipeline_mode = #tpu.pipeline_mode<synchronous>, transform_indices = @transform_1, window_bounds = array<i64: 32, 32>}, {pipeline_mode = #tpu.pipeline_mode<synchronous>, transform_indices = @transform_2, window_bounds = array<i64: 1, 32>}, {pipeline_mode = #tpu.pipeline_mode<synchronous>, transform_indices = @transform_3, window_bounds = array<i64: 32, 2>}, {pipeline_mode = #tpu.pipeline_mode<synchronous>, transform_indices = @transform_4, window_bounds = array<i64: 1, 2>}, {pipeline_mode = #tpu.pipeline_mode<synchronous>, transform_indices = @transform_5, window_bounds = array<i64: 2, 2>}]} {
    %c0 = arith.constant 0 : index
    %c0_0 = arith.constant 0 : index
    %0 = vector.load %arg1[%c0, %c0_0] : memref<2x32xf32, #tpu.memory_space<vmem>>, vector<2x32xf32>
    %c0_1 = arith.constant 0 : index
    %c0_2 = arith.constant 0 : index
    %1 = vector.load %arg2[%c0_1, %c0_2] : memref<32x32xf32, #tpu.memory_space<vmem>>, vector<32x32xf32>
    %cst = arith.constant dense<0.000000e+00> : vector<2x32xf32>
    %2 = tpu.matmul %0, %1, %cst {dimension_numbers = #tpu.dot_dimension_numbers<[1], [0], [0], [1], [0, 0, 1, 1], [], []>} : vector<2x32xf32>, vector<32x32xf32>, vector<2x32xf32> -> vector<2x32xf32>
    %c0_3 = arith.constant 0 : index
    %c0_4 = arith.constant 0 : index
    %3 = vector.load %arg3[%c0_3, %c0_4] : memref<1x32xf32, #tpu.memory_space<vmem>>, vector<1x32xf32>
    %4 = vector.broadcast %3 : vector<1x32xf32> to vector<2x32xf32>
    %5 = arith.addf %2, %4 : vector<2x32xf32>
    %6 = math.tanh %5 : vector<2x32xf32>
    %c0_5 = arith.constant 0 : index
    %c0_6 = arith.constant 0 : index
    %7 = vector.load %arg4[%c0_5, %c0_6] : memref<32x2xf32, #tpu.memory_space<vmem>>, vector<32x2xf32>
    %cst_7 = arith.constant dense<0.000000e+00> : vector<2x2xf32>
    %8 = tpu.matmul %6, %7, %cst_7 {dimension_numbers = #tpu.dot_dimension_numbers<[1], [0], [0], [1], [0, 0, 1, 1], [], []>} : vector<2x32xf32>, vector<32x2xf32>, vector<2x2xf32> -> vector<2x2xf32>
    %c0_8 = arith.constant 0 : index
    %c0_9 = arith.constant 0 : index
    %9 = vector.load %arg5[%c0_8, %c0_9] : memref<1x2xf32, #tpu.memory_space<vmem>>, vector<1x2xf32>
    %10 = vector.broadcast %9 : vector<1x2xf32> to vector<2x2xf32>
    %11 = arith.addf %8, %10 : vector<2x2xf32>
    %c0_10 = arith.constant 0 : index
    %c0_11 = arith.constant 0 : index
    %12 = vector.load %arg6[%c0_10, %c0_11] : memref<2x2xf32, #tpu.memory_space<vmem>>, vector<2x2xf32>
    tpu.vector_store %arg6[%c0_10, %c0_11], %11 {strides = array<i32>} : memref<2x2xf32, #tpu.memory_space<vmem>>, vector<2x2xf32>,
    return
  }
  func.func @transform_0(%arg0: i32) -> (i32, i32) {
    %c0_i32 = arith.constant 0 : i32
    %c0_i32_0 = arith.constant 0 : i32
    %c0_i32_1 = arith.constant 0 : i32
    return %c0_i32, %c0_i32_0 : i32, i32
  }
  func.func @transform_1(%arg0: i32) -> (i32, i32) {
    %c0_i32 = arith.constant 0 : i32
    %c0_i32_0 = arith.constant 0 : i32
    %c0_i32_1 = arith.constant 0 : i32
    return %c0_i32, %c0_i32_0 : i32, i32
  }
  func.func @transform_2(%arg0: i32) -> (i32, i32) {
    %c0_i32 = arith.constant 0 : i32
    %c0_i32_0 = arith.constant 0 : i32
    %c0_i32_1 = arith.constant 0 : i32
    return %c0_i32, %c0_i32_0 : i32, i32
  }
  func.func @transform_3(%arg0: i32) -> (i32, i32) {
    %c0_i32 = arith.constant 0 : i32
    %c0_i32_0 = arith.constant 0 : i32
    %c0_i32_1 = arith.constant 0 : i32
    return %c0_i32, %c0_i32_0 : i32, i32
  }
  func.func @transform_4(%arg0: i32) -> (i32, i32) {
    %c0_i32 = arith.constant 0 : i32
    %c0_i32_0 = arith.constant 0 : i32
    %c0_i32_1 = arith.constant 0 : i32
    return %c0_i32, %c0_i32_0 : i32, i32
  }
  func.func @transform_5(%arg0: i32) -> (i32, i32) {
    %c0_i32 = arith.constant 0 : i32
    %c0_i32_0 = arith.constant 0 : i32
    %c0_i32_1 = arith.constant 0 : i32
    return %c0_i32, %c0_i32_0 : i32, i32
  }
}

module attributes {stable_mosaic.version = 11 : i64} {
  func.func @_encoder_layer_kernel(%arg0: i32, %arg1: memref<1x8x32xf32, #tpu.memory_space<vmem>>, %arg2: memref<1x1x8xf32, #tpu.memory_space<vmem>>, %arg3: memref<32x96xf32, #tpu.memory_space<vmem>>, %arg4: memref<1x96xf32, #tpu.memory_space<vmem>>, %arg5: memref<32x32xf32, #tpu.memory_space<vmem>>, %arg6: memref<1x32xf32, #tpu.memory_space<vmem>>, %arg7: memref<1x32xf32, #tpu.memory_space<vmem>>, %arg8: memref<1x32xf32, #tpu.memory_space<vmem>>, %arg9: memref<32x64xf32, #tpu.memory_space<vmem>>, %arg10: memref<1x64xf32, #tpu.memory_space<vmem>>, %arg11: memref<64x32xf32, #tpu.memory_space<vmem>>, %arg12: memref<1x32xf32, #tpu.memory_space<vmem>>, %arg13: memref<1x32xf32, #tpu.memory_space<vmem>>, %arg14: memref<1x32xf32, #tpu.memory_space<vmem>>, %arg15: memref<1x8x32xf32, #tpu.memory_space<vmem>>) attributes {dimension_semantics = [#tpu.dimension_semantics<parallel>], iteration_bounds = array<i64: 2>, scalar_prefetch = 0 : i64, scratch_operands = 0 : i64, tpu.core_type = #tpu.core_type<tc>, window_params = [{transform_indices = @transform_0, window_bounds = array<i64: 1, 8, 32>}, {transform_indices = @transform_1, window_bounds = array<i64: 1, 1, 8>}, {pipeline_mode = #tpu.pipeline_mode<synchronous>, transform_indices = @transform_2, window_bounds = array<i64: 32, 96>}, {pipeline_mode = #tpu.pipeline_mode<synchronous>, transform_indices = @transform_3, window_bounds = array<i64: 1, 96>}, {pipeline_mode = #tpu.pipeline_mode<synchronous>, transform_indices = @transform_4, window_bounds = array<i64: 32, 32>}, {pipeline_mode = #tpu.pipeline_mode<synchronous>, transform_indices = @transform_5, window_bounds = array<i64: 1, 32>}, {pipeline_mode = #tpu.pipeline_mode<synchronous>, transform_indices = @transform_6, window_bounds = array<i64: 1, 32>}, {pipeline_mode = #tpu.pipeline_mode<synchronous>, transform_indices = @transform_7, window_bounds = array<i64: 1, 32>}, {pipeline_mode = #tpu.pipeline_mode<synchronous>, transform_indices = @transform_8, window_bounds = array<i64: 32, 64>}, {pipeline_mode = #tpu.pipeline_mode<synchronous>, transform_indices = @transform_9, window_bounds = array<i64: 1, 64>}, {pipeline_mode = #tpu.pipeline_mode<synchronous>, transform_indices = @transform_10, window_bounds = array<i64: 64, 32>}, {pipeline_mode = #tpu.pipeline_mode<synchronous>, transform_indices = @transform_11, window_bounds = array<i64: 1, 32>}, {pipeline_mode = #tpu.pipeline_mode<synchronous>, transform_indices = @transform_12, window_bounds = array<i64: 1, 32>}, {pipeline_mode = #tpu.pipeline_mode<synchronous>, transform_indices = @transform_13, window_bounds = array<i64: 1, 32>}, {transform_indices = @transform_14, window_bounds = array<i64: 1, 8, 32>}]} {
    %c0 = arith.constant 0 : index
    %c0_0 = arith.constant 0 : index
    %c0_1 = arith.constant 0 : index
    %0 = vector.load %arg1[%c0, %c0_0, %c0_1] : memref<1x8x32xf32, #tpu.memory_space<vmem>>, vector<1x8x32xf32>
    %1 = vector.shape_cast %0 : vector<1x8x32xf32> to vector<8x32xf32>
    %c0_2 = arith.constant 0 : index
    %c0_3 = arith.constant 0 : index
    %c0_4 = arith.constant 0 : index
    %2 = vector.load %arg2[%c0_2, %c0_3, %c0_4] : memref<1x1x8xf32, #tpu.memory_space<vmem>>, vector<1x1x8xf32>
    %3 = vector.shape_cast %2 : vector<1x1x8xf32> to vector<1x8xf32>
    %c0_5 = arith.constant 0 : index
    %c0_6 = arith.constant 0 : index
    %4 = vector.load %arg3[%c0_5, %c0_6] : memref<32x96xf32, #tpu.memory_space<vmem>>, vector<32x96xf32>
    %cst = arith.constant dense<0.000000e+00> : vector<8x96xf32>
    %5 = tpu.matmul %1, %4, %cst {dimension_numbers = #tpu.dot_dimension_numbers<[1], [0], [0], [1], [0, 0, 1, 1], [], []>} : vector<8x32xf32>, vector<32x96xf32>, vector<8x96xf32> -> vector<8x96xf32>
    %c0_7 = arith.constant 0 : index
    %c0_8 = arith.constant 0 : index
    %6 = vector.load %arg4[%c0_7, %c0_8] : memref<1x96xf32, #tpu.memory_space<vmem>>, vector<1x96xf32>
    %7 = vector.broadcast %6 : vector<1x96xf32> to vector<8x96xf32>
    %8 = arith.addf %5, %7 : vector<8x96xf32>
    %9 = vector.extract_strided_slice %8 {offsets = [0, 0], sizes = [8, 32], strides = [1, 1]} : vector<8x96xf32> to vector<8x32xf32>
    %10 = vector.extract_strided_slice %8 {offsets = [0, 32], sizes = [8, 32], strides = [1, 1]} : vector<8x96xf32> to vector<8x32xf32>
    %11 = vector.extract_strided_slice %8 {offsets = [0, 64], sizes = [8, 32], strides = [1, 1]} : vector<8x96xf32> to vector<8x32xf32>
    %c0_9 = arith.constant 0 : index
    %c0_10 = arith.constant 0 : index
    %12 = vector.load %arg5[%c0_9, %c0_10] : memref<32x32xf32, #tpu.memory_space<vmem>>, vector<32x32xf32>
    %c0_11 = arith.constant 0 : index
    %c0_12 = arith.constant 0 : index
    %13 = vector.load %arg6[%c0_11, %c0_12] : memref<1x32xf32, #tpu.memory_space<vmem>>, vector<1x32xf32>
    %14 = vector.extract_strided_slice %9 {offsets = [0, 0], sizes = [8, 8], strides = [1, 1]} : vector<8x32xf32> to vector<8x8xf32>
    %cst_13 = arith.constant 0.353553385 : f32
    %15 = vector.broadcast %cst_13 : f32 to vector<8x8xf32>
    %16 = arith.mulf %14, %15 : vector<8x8xf32>
    %17 = vector.extract_strided_slice %10 {offsets = [0, 0], sizes = [8, 8], strides = [1, 1]} : vector<8x32xf32> to vector<8x8xf32>
    %18 = vector.extract_strided_slice %11 {offsets = [0, 0], sizes = [8, 8], strides = [1, 1]} : vector<8x32xf32> to vector<8x8xf32>
    %19 = tpu.transpose %17, [1, 0] : vector<8x8xf32> -> vector<8x8xf32>
    %cst_14 = arith.constant dense<0.000000e+00> : vector<8x8xf32>
    %20 = tpu.matmul %16, %19, %cst_14 {dimension_numbers = #tpu.dot_dimension_numbers<[1], [0], [0], [1], [0, 0, 1, 1], [], []>} : vector<8x8xf32>, vector<8x8xf32>, vector<8x8xf32> -> vector<8x8xf32>
    %21 = vector.broadcast %3 : vector<1x8xf32> to vector<8x8xf32>
    %22 = arith.addf %20, %21 : vector<8x8xf32>
    %cst_15 = arith.constant dense<0xFF800000> : vector<8xf32>
    %23 = vector.multi_reduction <maximumf>, %22, %cst_15 [1] : vector<8x8xf32> to vector<8xf32>
    %24 = vector.shape_cast %23 : vector<8xf32> to vector<8x1xf32>
    %25 = vector.broadcast %24 : vector<8x1xf32> to vector<8x8xf32>
    %26 = arith.subf %22, %25 : vector<8x8xf32>
    %27 = math.exp %26 : vector<8x8xf32>
    %cst_16 = arith.constant dense<0.000000e+00> : vector<8xf32>
    %28 = vector.multi_reduction <add>, %27, %cst_16 [1] : vector<8x8xf32> to vector<8xf32>
    %29 = vector.shape_cast %28 : vector<8xf32> to vector<8x1xf32>
    %30 = tpu.reciprocal %29 {approx = true} : vector<8x1xf32> -> vector<8x1xf32>
    %31 = vector.broadcast %30 : vector<8x1xf32> to vector<8x8xf32>
    %32 = arith.mulf %27, %31 : vector<8x8xf32>
    %cst_17 = arith.constant dense<0.000000e+00> : vector<8x8xf32>
    %33 = tpu.matmul %32, %18, %cst_17 {dimension_numbers = #tpu.dot_dimension_numbers<[1], [0], [0], [1], [0, 0, 1, 1], [], []>} : vector<8x8xf32>, vector<8x8xf32>, vector<8x8xf32> -> vector<8x8xf32>
    %34 = vector.extract_strided_slice %12 {offsets = [0, 0], sizes = [8, 32], strides = [1, 1]} : vector<32x32xf32> to vector<8x32xf32>
    %cst_18 = arith.constant dense<0.000000e+00> : vector<8x32xf32>
    %35 = tpu.matmul %33, %34, %cst_18 {dimension_numbers = #tpu.dot_dimension_numbers<[1], [0], [0], [1], [0, 0, 1, 1], [], []>} : vector<8x8xf32>, vector<8x32xf32>, vector<8x32xf32> -> vector<8x32xf32>
    %36 = vector.broadcast %13 : vector<1x32xf32> to vector<8x32xf32>
    %37 = arith.addf %36, %35 : vector<8x32xf32>
    %38 = vector.extract_strided_slice %9 {offsets = [0, 8], sizes = [8, 8], strides = [1, 1]} : vector<8x32xf32> to vector<8x8xf32>
    %cst_19 = arith.constant 0.353553385 : f32
    %39 = vector.broadcast %cst_19 : f32 to vector<8x8xf32>
    %40 = arith.mulf %38, %39 : vector<8x8xf32>
    %41 = vector.extract_strided_slice %10 {offsets = [0, 8], sizes = [8, 8], strides = [1, 1]} : vector<8x32xf32> to vector<8x8xf32>
    %42 = vector.extract_strided_slice %11 {offsets = [0, 8], sizes = [8, 8], strides = [1, 1]} : vector<8x32xf32> to vector<8x8xf32>
    %43 = tpu.transpose %41, [1, 0] : vector<8x8xf32> -> vector<8x8xf32>
    %cst_20 = arith.constant dense<0.000000e+00> : vector<8x8xf32>
    %44 = tpu.matmul %40, %43, %cst_20 {dimension_numbers = #tpu.dot_dimension_numbers<[1], [0], [0], [1], [0, 0, 1, 1], [], []>} : vector<8x8xf32>, vector<8x8xf32>, vector<8x8xf32> -> vector<8x8xf32>
    %45 = vector.broadcast %3 : vector<1x8xf32> to vector<8x8xf32>
    %46 = arith.addf %44, %45 : vector<8x8xf32>
    %cst_21 = arith.constant dense<0xFF800000> : vector<8xf32>
    %47 = vector.multi_reduction <maximumf>, %46, %cst_21 [1] : vector<8x8xf32> to vector<8xf32>
    %48 = vector.shape_cast %47 : vector<8xf32> to vector<8x1xf32>
    %49 = vector.broadcast %48 : vector<8x1xf32> to vector<8x8xf32>
    %50 = arith.subf %46, %49 : vector<8x8xf32>
    %51 = math.exp %50 : vector<8x8xf32>
    %cst_22 = arith.constant dense<0.000000e+00> : vector<8xf32>
    %52 = vector.multi_reduction <add>, %51, %cst_22 [1] : vector<8x8xf32> to vector<8xf32>
    %53 = vector.shape_cast %52 : vector<8xf32> to vector<8x1xf32>
    %54 = tpu.reciprocal %53 {approx = true} : vector<8x1xf32> -> vector<8x1xf32>
    %55 = vector.broadcast %54 : vector<8x1xf32> to vector<8x8xf32>
    %56 = arith.mulf %51, %55 : vector<8x8xf32>
    %cst_23 = arith.constant dense<0.000000e+00> : vector<8x8xf32>
    %57 = tpu.matmul %56, %42, %cst_23 {dimension_numbers = #tpu.dot_dimension_numbers<[1], [0], [0], [1], [0, 0, 1, 1], [], []>} : vector<8x8xf32>, vector<8x8xf32>, vector<8x8xf32> -> vector<8x8xf32>
    %58 = vector.extract_strided_slice %12 {offsets = [8, 0], sizes = [8, 32], strides = [1, 1]} : vector<32x32xf32> to vector<8x32xf32>
    %cst_24 = arith.constant dense<0.000000e+00> : vector<8x32xf32>
    %59 = tpu.matmul %57, %58, %cst_24 {dimension_numbers = #tpu.dot_dimension_numbers<[1], [0], [0], [1], [0, 0, 1, 1], [], []>} : vector<8x8xf32>, vector<8x32xf32>, vector<8x32xf32> -> vector<8x32xf32>
    %60 = arith.addf %37, %59 : vector<8x32xf32>
    %61 = vector.extract_strided_slice %9 {offsets = [0, 16], sizes = [8, 8], strides = [1, 1]} : vector<8x32xf32> to vector<8x8xf32>
    %cst_25 = arith.constant 0.353553385 : f32
    %62 = vector.broadcast %cst_25 : f32 to vector<8x8xf32>
    %63 = arith.mulf %61, %62 : vector<8x8xf32>
    %64 = vector.extract_strided_slice %10 {offsets = [0, 16], sizes = [8, 8], strides = [1, 1]} : vector<8x32xf32> to vector<8x8xf32>
    %65 = vector.extract_strided_slice %11 {offsets = [0, 16], sizes = [8, 8], strides = [1, 1]} : vector<8x32xf32> to vector<8x8xf32>
    %66 = tpu.transpose %64, [1, 0] : vector<8x8xf32> -> vector<8x8xf32>
    %cst_26 = arith.constant dense<0.000000e+00> : vector<8x8xf32>
    %67 = tpu.matmul %63, %66, %cst_26 {dimension_numbers = #tpu.dot_dimension_numbers<[1], [0], [0], [1], [0, 0, 1, 1], [], []>} : vector<8x8xf32>, vector<8x8xf32>, vector<8x8xf32> -> vector<8x8xf32>
    %68 = vector.broadcast %3 : vector<1x8xf32> to vector<8x8xf32>
    %69 = arith.addf %67, %68 : vector<8x8xf32>
    %cst_27 = arith.constant dense<0xFF800000> : vector<8xf32>
    %70 = vector.multi_reduction <maximumf>, %69, %cst_27 [1] : vector<8x8xf32> to vector<8xf32>
    %71 = vector.shape_cast %70 : vector<8xf32> to vector<8x1xf32>
    %72 = vector.broadcast %71 : vector<8x1xf32> to vector<8x8xf32>
    %73 = arith.subf %69, %72 : vector<8x8xf32>
    %74 = math.exp %73 : vector<8x8xf32>
    %cst_28 = arith.constant dense<0.000000e+00> : vector<8xf32>
    %75 = vector.multi_reduction <add>, %74, %cst_28 [1] : vector<8x8xf32> to vector<8xf32>
    %76 = vector.shape_cast %75 : vector<8xf32> to vector<8x1xf32>
    %77 = tpu.reciprocal %76 {approx = true} : vector<8x1xf32> -> vector<8x1xf32>
    %78 = vector.broadcast %77 : vector<8x1xf32> to vector<8x8xf32>
    %79 = arith.mulf %74, %78 : vector<8x8xf32>
    %cst_29 = arith.constant dense<0.000000e+00> : vector<8x8xf32>
    %80 = tpu.matmul %79, %65, %cst_29 {dimension_numbers = #tpu.dot_dimension_numbers<[1], [0], [0], [1], [0, 0, 1, 1], [], []>} : vector<8x8xf32>, vector<8x8xf32>, vector<8x8xf32> -> vector<8x8xf32>
    %81 = vector.extract_strided_slice %12 {offsets = [16, 0], sizes = [8, 32], strides = [1, 1]} : vector<32x32xf32> to vector<8x32xf32>
    %cst_30 = arith.constant dense<0.000000e+00> : vector<8x32xf32>
    %82 = tpu.matmul %80, %81, %cst_30 {dimension_numbers = #tpu.dot_dimension_numbers<[1], [0], [0], [1], [0, 0, 1, 1], [], []>} : vector<8x8xf32>, vector<8x32xf32>, vector<8x32xf32> -> vector<8x32xf32>
    %83 = arith.addf %60, %82 : vector<8x32xf32>
    %84 = vector.extract_strided_slice %9 {offsets = [0, 24], sizes = [8, 8], strides = [1, 1]} : vector<8x32xf32> to vector<8x8xf32>
    %cst_31 = arith.constant 0.353553385 : f32
    %85 = vector.broadcast %cst_31 : f32 to vector<8x8xf32>
    %86 = arith.mulf %84, %85 : vector<8x8xf32>
    %87 = vector.extract_strided_slice %10 {offsets = [0, 24], sizes = [8, 8], strides = [1, 1]} : vector<8x32xf32> to vector<8x8xf32>
    %88 = vector.extract_strided_slice %11 {offsets = [0, 24], sizes = [8, 8], strides = [1, 1]} : vector<8x32xf32> to vector<8x8xf32>
    %89 = tpu.transpose %87, [1, 0] : vector<8x8xf32> -> vector<8x8xf32>
    %cst_32 = arith.constant dense<0.000000e+00> : vector<8x8xf32>
    %90 = tpu.matmul %86, %89, %cst_32 {dimension_numbers = #tpu.dot_dimension_numbers<[1], [0], [0], [1], [0, 0, 1, 1], [], []>} : vector<8x8xf32>, vector<8x8xf32>, vector<8x8xf32> -> vector<8x8xf32>
    %91 = vector.broadcast %3 : vector<1x8xf32> to vector<8x8xf32>
    %92 = arith.addf %90, %91 : vector<8x8xf32>
    %cst_33 = arith.constant dense<0xFF800000> : vector<8xf32>
    %93 = vector.multi_reduction <maximumf>, %92, %cst_33 [1] : vector<8x8xf32> to vector<8xf32>
    %94 = vector.shape_cast %93 : vector<8xf32> to vector<8x1xf32>
    %95 = vector.broadcast %94 : vector<8x1xf32> to vector<8x8xf32>
    %96 = arith.subf %92, %95 : vector<8x8xf32>
    %97 = math.exp %96 : vector<8x8xf32>
    %cst_34 = arith.constant dense<0.000000e+00> : vector<8xf32>
    %98 = vector.multi_reduction <add>, %97, %cst_34 [1] : vector<8x8xf32> to vector<8xf32>
    %99 = vector.shape_cast %98 : vector<8xf32> to vector<8x1xf32>
    %100 = tpu.reciprocal %99 {approx = true} : vector<8x1xf32> -> vector<8x1xf32>
    %101 = vector.broadcast %100 : vector<8x1xf32> to vector<8x8xf32>
    %102 = arith.mulf %97, %101 : vector<8x8xf32>
    %cst_35 = arith.constant dense<0.000000e+00> : vector<8x8xf32>
    %103 = tpu.matmul %102, %88, %cst_35 {dimension_numbers = #tpu.dot_dimension_numbers<[1], [0], [0], [1], [0, 0, 1, 1], [], []>} : vector<8x8xf32>, vector<8x8xf32>, vector<8x8xf32> -> vector<8x8xf32>
    %104 = vector.extract_strided_slice %12 {offsets = [24, 0], sizes = [8, 32], strides = [1, 1]} : vector<32x32xf32> to vector<8x32xf32>
    %cst_36 = arith.constant dense<0.000000e+00> : vector<8x32xf32>
    %105 = tpu.matmul %103, %104, %cst_36 {dimension_numbers = #tpu.dot_dimension_numbers<[1], [0], [0], [1], [0, 0, 1, 1], [], []>} : vector<8x8xf32>, vector<8x32xf32>, vector<8x32xf32> -> vector<8x32xf32>
    %106 = arith.addf %83, %105 : vector<8x32xf32>
    %107 = arith.addf %106, %1 : vector<8x32xf32>
    %c0_37 = arith.constant 0 : index
    %c0_38 = arith.constant 0 : index
    %108 = vector.load %arg7[%c0_37, %c0_38] : memref<1x32xf32, #tpu.memory_space<vmem>>, vector<1x32xf32>
    %c0_39 = arith.constant 0 : index
    %c0_40 = arith.constant 0 : index
    %109 = vector.load %arg8[%c0_39, %c0_40] : memref<1x32xf32, #tpu.memory_space<vmem>>, vector<1x32xf32>
    %cst_41 = arith.constant dense<0.000000e+00> : vector<8xf32>
    %110 = vector.multi_reduction <add>, %107, %cst_41 [1] : vector<8x32xf32> to vector<8xf32>
    %111 = vector.shape_cast %110 : vector<8xf32> to vector<8x1xf32>
    %cst_42 = arith.constant 3.200000e+01 : f32
    %112 = vector.broadcast %cst_42 : f32 to vector<8x1xf32>
    %113 = arith.divf %111, %112 : vector<8x1xf32>
    %114 = vector.broadcast %113 : vector<8x1xf32> to vector<8x32xf32>
    %115 = arith.subf %107, %114 : vector<8x32xf32>
    %116 = arith.mulf %115, %115 : vector<8x32xf32>
    %cst_43 = arith.constant dense<0.000000e+00> : vector<8xf32>
    %117 = vector.multi_reduction <add>, %116, %cst_43 [1] : vector<8x32xf32> to vector<8xf32>
    %118 = vector.shape_cast %117 : vector<8xf32> to vector<8x1xf32>
    %cst_44 = arith.constant 3.200000e+01 : f32
    %119 = vector.broadcast %cst_44 : f32 to vector<8x1xf32>
    %120 = arith.divf %118, %119 : vector<8x1xf32>
    %121 = vector.broadcast %113 : vector<8x1xf32> to vector<8x32xf32>
    %122 = arith.subf %107, %121 : vector<8x32xf32>
    %cst_45 = arith.constant 9.99999974E-6 : f32
    %123 = vector.broadcast %cst_45 : f32 to vector<8x1xf32>
    %124 = arith.addf %120, %123 : vector<8x1xf32>
    %125 = math.rsqrt %124 : vector<8x1xf32>
    %126 = vector.broadcast %125 : vector<8x1xf32> to vector<8x32xf32>
    %127 = arith.mulf %122, %126 : vector<8x32xf32>
    %128 = vector.broadcast %108 : vector<1x32xf32> to vector<8x32xf32>
    %129 = arith.mulf %127, %128 : vector<8x32xf32>
    %130 = vector.broadcast %109 : vector<1x32xf32> to vector<8x32xf32>
    %131 = arith.addf %129, %130 : vector<8x32xf32>
    %c0_46 = arith.constant 0 : index
    %c0_47 = arith.constant 0 : index
    %132 = vector.load %arg9[%c0_46, %c0_47] : memref<32x64xf32, #tpu.memory_space<vmem>>, vector<32x64xf32>
    %cst_48 = arith.constant dense<0.000000e+00> : vector<8x64xf32>
    %133 = tpu.matmul %131, %132, %cst_48 {dimension_numbers = #tpu.dot_dimension_numbers<[1], [0], [0], [1], [0, 0, 1, 1], [], []>} : vector<8x32xf32>, vector<32x64xf32>, vector<8x64xf32> -> vector<8x64xf32>
    %c0_49 = arith.constant 0 : index
    %c0_50 = arith.constant 0 : index
    %134 = vector.load %arg10[%c0_49, %c0_50] : memref<1x64xf32, #tpu.memory_space<vmem>>, vector<1x64xf32>
    %135 = vector.broadcast %134 : vector<1x64xf32> to vector<8x64xf32>
    %136 = arith.addf %133, %135 : vector<8x64xf32>
    %cst_51 = arith.constant 5.000000e-01 : f32
    %137 = vector.broadcast %cst_51 : f32 to vector<8x64xf32>
    %138 = arith.mulf %137, %136 : vector<8x64xf32>
    %cst_52 = arith.constant 2.000000e+00 : f32
    %139 = math.sqrt %cst_52 : f32
    %cst_53 = arith.constant 1.000000e+00 : f32
    %140 = arith.divf %cst_53, %139 : f32
    %141 = vector.broadcast %140 : f32 to vector<8x64xf32>
    %142 = arith.mulf %136, %141 : vector<8x64xf32>
    %143 = math.erf %142 : vector<8x64xf32>
    %cst_54 = arith.constant 1.000000e+00 : f32
    %144 = vector.broadcast %cst_54 : f32 to vector<8x64xf32>
    %145 = arith.addf %144, %143 : vector<8x64xf32>
    %146 = arith.mulf %138, %145 : vector<8x64xf32>
    %c0_55 = arith.constant 0 : index
    %c0_56 = arith.constant 0 : index
    %147 = vector.load %arg11[%c0_55, %c0_56] : memref<64x32xf32, #tpu.memory_space<vmem>>, vector<64x32xf32>
    %cst_57 = arith.constant dense<0.000000e+00> : vector<8x32xf32>
    %148 = tpu.matmul %146, %147, %cst_57 {dimension_numbers = #tpu.dot_dimension_numbers<[1], [0], [0], [1], [0, 0, 1, 1], [], []>} : vector<8x64xf32>, vector<64x32xf32>, vector<8x32xf32> -> vector<8x32xf32>
    %c0_58 = arith.constant 0 : index
    %c0_59 = arith.constant 0 : index
    %149 = vector.load %arg12[%c0_58, %c0_59] : memref<1x32xf32, #tpu.memory_space<vmem>>, vector<1x32xf32>
    %150 = vector.broadcast %149 : vector<1x32xf32> to vector<8x32xf32>
    %151 = arith.addf %148, %150 : vector<8x32xf32>
    %152 = arith.addf %151, %131 : vector<8x32xf32>
    %c0_60 = arith.constant 0 : index
    %c0_61 = arith.constant 0 : index
    %153 = vector.load %arg13[%c0_60, %c0_61] : memref<1x32xf32, #tpu.memory_space<vmem>>, vector<1x32xf32>
    %c0_62 = arith.constant 0 : index
    %c0_63 = arith.constant 0 : index
    %154 = vector.load %arg14[%c0_62, %c0_63] : memref<1x32xf32, #tpu.memory_space<vmem>>, vector<1x32xf32>
    %cst_64 = arith.constant dense<0.000000e+00> : vector<8xf32>
    %155 = vector.multi_reduction <add>, %152, %cst_64 [1] : vector<8x32xf32> to vector<8xf32>
    %156 = vector.shape_cast %155 : vector<8xf32> to vector<8x1xf32>
    %cst_65 = arith.constant 3.200000e+01 : f32
    %157 = vector.broadcast %cst_65 : f32 to vector<8x1xf32>
    %158 = arith.divf %156, %157 : vector<8x1xf32>
    %159 = vector.broadcast %158 : vector<8x1xf32> to vector<8x32xf32>
    %160 = arith.subf %152, %159 : vector<8x32xf32>
    %161 = arith.mulf %160, %160 : vector<8x32xf32>
    %cst_66 = arith.constant dense<0.000000e+00> : vector<8xf32>
    %162 = vector.multi_reduction <add>, %161, %cst_66 [1] : vector<8x32xf32> to vector<8xf32>
    %163 = vector.shape_cast %162 : vector<8xf32> to vector<8x1xf32>
    %cst_67 = arith.constant 3.200000e+01 : f32
    %164 = vector.broadcast %cst_67 : f32 to vector<8x1xf32>
    %165 = arith.divf %163, %164 : vector<8x1xf32>
    %166 = vector.broadcast %158 : vector<8x1xf32> to vector<8x32xf32>
    %167 = arith.subf %152, %166 : vector<8x32xf32>
    %cst_68 = arith.constant 9.99999974E-6 : f32
    %168 = vector.broadcast %cst_68 : f32 to vector<8x1xf32>
    %169 = arith.addf %165, %168 : vector<8x1xf32>
    %170 = math.rsqrt %169 : vector<8x1xf32>
    %171 = vector.broadcast %170 : vector<8x1xf32> to vector<8x32xf32>
    %172 = arith.mulf %167, %171 : vector<8x32xf32>
    %173 = vector.broadcast %153 : vector<1x32xf32> to vector<8x32xf32>
    %174 = arith.mulf %172, %173 : vector<8x32xf32>
    %175 = vector.broadcast %154 : vector<1x32xf32> to vector<8x32xf32>
    %176 = arith.addf %174, %175 : vector<8x32xf32>
    %c0_69 = arith.constant 0 : index
    %c0_70 = arith.constant 0 : index
    %c0_71 = arith.constant 0 : index
    %177 = vector.load %arg15[%c0_69, %c0_70, %c0_71] : memref<1x8x32xf32, #tpu.memory_space<vmem>>, vector<1x8x32xf32>
    %178 = vector.shape_cast %177 : vector<1x8x32xf32> to vector<8x32xf32>
    %179 = vector.shape_cast %176 : vector<8x32xf32> to vector<1x8x32xf32>
    tpu.vector_store %arg15[%c0_69, %c0_70, %c0_71], %179 {strides = array<i32>} : memref<1x8x32xf32, #tpu.memory_space<vmem>>, vector<1x8x32xf32>,
    return
  }
  func.func @transform_0(%arg0: i32) -> (i32, i32, i32) {
    %c0_i32 = arith.constant 0 : i32
    %c0_i32_0 = arith.constant 0 : i32
    %c0_i32_1 = arith.constant 0 : i32
    return %arg0, %c0_i32, %c0_i32_0 : i32, i32, i32
  }
  func.func @transform_1(%arg0: i32) -> (i32, i32, i32) {
    %c0_i32 = arith.constant 0 : i32
    %c0_i32_0 = arith.constant 0 : i32
    %c0_i32_1 = arith.constant 0 : i32
    return %arg0, %c0_i32, %c0_i32_0 : i32, i32, i32
  }
  func.func @transform_2(%arg0: i32) -> (i32, i32) {
    %c0_i32 = arith.constant 0 : i32
    %c0_i32_0 = arith.constant 0 : i32
    %c0_i32_1 = arith.constant 0 : i32
    return %c0_i32, %c0_i32_0 : i32, i32
  }
  func.func @transform_3(%arg0: i32) -> (i32, i32) {
    %c0_i32 = arith.constant 0 : i32
    %c0_i32_0 = arith.constant 0 : i32
    %c0_i32_1 = arith.constant 0 : i32
    return %c0_i32, %c0_i32_0 : i32, i32
  }
  func.func @transform_4(%arg0: i32) -> (i32, i32) {
    %c0_i32 = arith.constant 0 : i32
    %c0_i32_0 = arith.constant 0 : i32
    %c0_i32_1 = arith.constant 0 : i32
    return %c0_i32, %c0_i32_0 : i32, i32
  }
  func.func @transform_5(%arg0: i32) -> (i32, i32) {
    %c0_i32 = arith.constant 0 : i32
    %c0_i32_0 = arith.constant 0 : i32
    %c0_i32_1 = arith.constant 0 : i32
    return %c0_i32, %c0_i32_0 : i32, i32
  }
  func.func @transform_6(%arg0: i32) -> (i32, i32) {
    %c0_i32 = arith.constant 0 : i32
    %c0_i32_0 = arith.constant 0 : i32
    %c0_i32_1 = arith.constant 0 : i32
    return %c0_i32, %c0_i32_0 : i32, i32
  }
  func.func @transform_7(%arg0: i32) -> (i32, i32) {
    %c0_i32 = arith.constant 0 : i32
    %c0_i32_0 = arith.constant 0 : i32
    %c0_i32_1 = arith.constant 0 : i32
    return %c0_i32, %c0_i32_0 : i32, i32
  }
  func.func @transform_8(%arg0: i32) -> (i32, i32) {
    %c0_i32 = arith.constant 0 : i32
    %c0_i32_0 = arith.constant 0 : i32
    %c0_i32_1 = arith.constant 0 : i32
    return %c0_i32, %c0_i32_0 : i32, i32
  }
  func.func @transform_9(%arg0: i32) -> (i32, i32) {
    %c0_i32 = arith.constant 0 : i32
    %c0_i32_0 = arith.constant 0 : i32
    %c0_i32_1 = arith.constant 0 : i32
    return %c0_i32, %c0_i32_0 : i32, i32
  }
  func.func @transform_10(%arg0: i32) -> (i32, i32) {
    %c0_i32 = arith.constant 0 : i32
    %c0_i32_0 = arith.constant 0 : i32
    %c0_i32_1 = arith.constant 0 : i32
    return %c0_i32, %c0_i32_0 : i32, i32
  }
  func.func @transform_11(%arg0: i32) -> (i32, i32) {
    %c0_i32 = arith.constant 0 : i32
    %c0_i32_0 = arith.constant 0 : i32
    %c0_i32_1 = arith.constant 0 : i32
    return %c0_i32, %c0_i32_0 : i32, i32
  }
  func.func @transform_12(%arg0: i32) -> (i32, i32) {
    %c0_i32 = arith.constant 0 : i32
    %c0_i32_0 = arith.constant 0 : i32
    %c0_i32_1 = arith.constant 0 : i32
    return %c0_i32, %c0_i32_0 : i32, i32
  }
  func.func @transform_13(%arg0: i32) -> (i32, i32) {
    %c0_i32 = arith.constant 0 : i32
    %c0_i32_0 = arith.constant 0 : i32
    %c0_i32_1 = arith.constant 0 : i32
    return %c0_i32, %c0_i32_0 : i32, i32
  }
  func.func @transform_14(%arg0: i32) -> (i32, i32, i32) {
    %c0_i32 = arith.constant 0 : i32
    %c0_i32_0 = arith.constant 0 : i32
    %c0_i32_1 = arith.constant 0 : i32
    return %arg0, %c0_i32, %c0_i32_0 : i32, i32, i32
  }
}

</mosaic_0001>

<bundles_post_ra>
// kernel: roberta_forward.4
= control target key start
LH: loop header
LB: loop body
LE: loop exit
PB: predicated region body
PF: predicated region fallthrough
CT: control target
= control target key end

     0   :  { %vm18_vm0 = vcmask 261120   ;;  %s118_s0 = inlined_call_operand.vmem [shape: f32[16,32], index: 0, kind: input, shape index: {}]   ;;  %s119_s1 = inlined_call_operand.vmem [shape: f32[1,32], index: 1, kind: input, shape index: {}]   ;;  %s120_s2 = inlined_call_operand.vmem [shape: f32[1,32], index: 2, kind: input, shape index: {}]   ;;  %s121_s3 = inlined_call_operand.vmem [shape: f32[16,32], index: 3, kind: output, shape index: {}]  }
   0x1   :  { %v14_v0 = vld [vmem:[%s118_s0] sm:$0xff]  ;;  %v15_v1 = vld [vmem:[%s118_s0 + $0x8] sm:$0xff] }
   0x2   :  { %v19_v2 = vsel %vm18_vm0, %v14_v0, 0.0  ;;  %v22_v3 = vsel %vm18_vm0, %v15_v1, 0.0  ;;  %v68_v21 = vld [vmem:[%s119_s1] ss:$0 sm:$0xff] }
   0x3   :  { %20 = vadd.xlane.f32.xlu0 %v19_v2  ;;  %v69_v23 = vld [vmem:[%s120_s2] ss:$0 sm:$0xff] }
   0x7   :  { %23 = vadd.xlane.f32.xlu0 %v22_v3 }
  0x90   :  { %v21_v4 = vpop.xlane.xlu0 %20 }
  0x91   :  { %v26_v5 = vmul.f32 0.03125, %v21_v4 }
  0x93   :  { %v28_v6 = vsub.f32 %v14_v0, %v26_v5 }
  0x94   :  { %v24_v7 = vpop.xlane.xlu0 %23 }
  0x95   :  { %v27_v8 = vmul.f32 0.03125, %v24_v7  ;;  %v30_v9 = vmul.f32 %v28_v6, %v28_v6 }
  0x97   :  { %v29_v10 = vsub.f32 %v15_v1, %v27_v8  ;;  %v32_v11 = vsel %vm18_vm0, %v30_v9, 0.0 }
  0x98   :  { %33 = vadd.xlane.f32.xlu1 %v32_v11 }
  0x99   :  { %v31_v12 = vmul.f32 %v29_v10, %v29_v10 }
  0x9b   :  { %v35_v13 = vsel %vm18_vm0, %v31_v12, 0.0 }
  0x9c   :  { %36 = vadd.xlane.f32.xlu1 %v35_v13 }
 0x125   :  { %v34_v14 = vpop.xlane.xlu1 %33 }
 0x126   :  { %v38_v15 = vmul.f32 0.03125, %v34_v14 }
 0x128   :  { %v40_v16 = vadd.f32 1e-05, %v38_v15 }
 0x129   :  { %v37_v17 = vpop.xlane.xlu1 %36 }
 0x12a   :  { %70 = vrsqrt.f32 %v40_v16  ;;  %v39_v18 = vmul.f32 0.03125, %v37_v17 }
 0x12c   :  { %v41_v19 = vadd.f32 1e-05, %v39_v18 }
 0x12e   :  { %72 = vrsqrt.f32 %v41_v19 }
 0x134   :  { %v71_v20 = vpop.eup %70 }
 0x135   :  { %v44_v22 = vmul.f32 %v71_v20, %v28_v6 }
 0x137   :  { %v52_v24 = vmul.f32 %v68_v21, %v44_v22 }
 0x138   :  { %v73_v25 = vpop.eup %72 }
 0x139   :  { %v60_v26 = vadd.f32 %v69_v23, %v52_v24  ;;  %v45_v27 = vmul.f32 %v73_v25, %v29_v10 }
 0x13b   :  { %62 = vst.msk [vmem:[%s121_s3] sm:$0xff] %vm18_vm0, %v60_v26  ;;  %v53_v28 = vmul.f32 %v68_v21, %v45_v27 }
 0x13d   :  { %v61_v29 = vadd.f32 %v69_v23, %v53_v28 }
 0x13f   :  { %63 = vst.msk [vmem:[%s121_s3 + $0x8] sm:$0xff] %vm18_vm0, %v61_v29 }

// kernel: roberta_forward.7
= control target key start
LH: loop header
LB: loop body
LE: loop exit
PB: predicated region body
PF: predicated region fallthrough
CT: control target
= control target key end

     0   :  { %v250_v0 = vmov 0.0|0.0   ;;  %vm251_vm0 = vmmov 0   ;;  %v252_v4 = vmov 0.0   ;;  %vm32_vm1 = vcmask 261120   ;;  %s321_s1 = inlined_call_operand.vmem [shape: f32[32,32], index: 1, kind: input, shape index: {}]   ;;  %s322_s0 = inlined_call_operand.vmem [shape: f32[2,32], index: 0, kind: input, shape index: {}]   ;;  %s323_s3 = inlined_call_operand.vmem [shape: f32[32,2], index: 3, kind: input, shape index: {}]   ;;  %s324_s2 = inlined_call_operand.vmem [shape: f32[1,32], index: 2, kind: input, shape index: {}]   ;;  %s325_s4 = inlined_call_operand.vmem [shape: f32[1,2], index: 4, kind: input, shape index: {}]   ;;  %s326_s5 = inlined_call_operand.vmem [shape: f32[2,2], index: 5, kind: output, shape index: {}]  }
   0x1   :  { %233 = vmatprep.subr.bf16.mxu0 %v250_v0  ;;  %v21_v1 = vld [vmem:[%s321_s1] sm:$0xff]  ;;  %v22_v2 = vld [vmem:[%s321_s1 + $0x8] sm:$0xff]  ;;  %v23_v3 = vld [vmem:[%s321_s1 + $0x10] sm:$0xff]  ;;  %219 = vmatprep.mubr.msk.f32.mxu0 %vm251_vm0, %v252_v4  ;;  %vm191_vm2 = vcmask 9216  }
   0x2   :  { %v234_v5 = vpack.c.bf16 %v22_v2, %v21_v1  ;;  %v24_v6 = vld [vmem:[%s321_s1 + $0x18] sm:$0xff]  ;;  %239 = vmatprep.subr.bf16.mxu1 %v250_v0  ;;  %230 = vmatprep.mubr.msk.f32.mxu1 %vm251_vm0, %v252_v4  ;;  %v20_v8 = vld [vmem:[%s322_s0] sm:$0x3]  ;;  %v108_v10 = vld [vmem:[%s323_s3 + $0x8] sm:$0xff] }
   0x3   :  { %v237_v7 = vpack.c.bf16 %v24_v6, %v23_v3  ;;  %v107_v9 = vld [vmem:[%s323_s3] sm:$0xff]  ;;  %v109_v11 = vld [vmem:[%s323_s3 + $0x10] sm:$0xff]  ;;  %v110_v13 = vld [vmem:[%s323_s3 + $0x18] sm:$0xff] }
   0x4   :  { %235 = vmatpush3.bf16.msra.mxu0 %v234_v5  ;;  %v240_v12 = vpack.c.bf16 %v108_v10, %v107_v9  ;;  %v243_v14 = vpack.c.bf16 %v110_v13, %v109_v11  ;;  %v197_v15 = vld [vmem:[%s324_s2] ss:$0 sm:$0xff] }
   0x5   :  { %236 = vmatprep.subr.bf16.mxu0 %v250_v0  ;;  %v199_v20 = vld [vmem:[%s325_s4] ss:$0 sm:$0xff] }
   0x6   :  { %241 = vmatpush3.bf16.msra.mxu1 %v240_v12 }
   0x7   :  { %242 = vmatprep.subr.bf16.mxu1 %v250_v0 }
   0x8   :  { %238 = vmatpush3.bf16.msra.mxu0 %v237_v7 }
   0xa   :  { %244 = vmatpush3.bf16.msra.mxu1 %v243_v14 }
   0xb   :  { %220 = vmatmul.mubr.msk.f32.vlgmr.msra.gmra.mrb[0].mxu0 %vm32_vm1, %v20_v8 }
  0xde   :  { %v102_v16 = vpop.f32.mrb[0].mxu0 }
  0xdf   :  { %v103_v17 = vadd.f32 %v197_v15, %v102_v16  ;;  %v221_v18 = vpop.f32.mrb[1].mxu0 }
  0xe1   :  { %248 = vtanh.f32 %v103_v17 }
  0xeb   :  { %v249_v19 = vpop.eup %248 }
  0xec   :  { %231 = vmatmul.mubr.msk.f32.vlgmr.msra.gmra.mrb[0].mxu1 %vm32_vm1, %v249_v19 }
 0x1bf   :  { %v187_v21 = vpop.f32.mrb[0].mxu1 }
 0x1c0   :  { %v188_v22 = vadd.f32 %v199_v20, %v187_v21  ;;  %v232_v23 = vpop.f32.mrb[1].mxu1 }
 0x1c2   :  { %192 = vst.msk [vmem:[%s326_s5] sm:$0x3] %vm191_vm2, %v188_v22 }

// kernel: roberta_forward.5
= control target key start
LH: loop header
LB: loop body
LE: loop exit
PB: predicated region body
PF: predicated region fallthrough
CT: control target
= control target key end

     0   :  { %s2187_s29 = smov 0   ;;  %s2407_s0 = inlined_call_operand.vmem [shape: f32[2,8,32], index: 0, kind: input, shape index: {}]   ;;  %s2408_s1 = inlined_call_operand.vmem [shape: f32[2,1,8], index: 1, kind: input, shape index: {}]   ;;  %s2409_s2 = inlined_call_operand.vmem [shape: f32[32,96], index: 2, kind: input, shape index: {}]   ;;  %s2410_s3 = inlined_call_operand.vmem [shape: f32[1,96], index: 3, kind: input, shape index: {}]   ;;  %s2411_s4 = inlined_call_operand.vmem [shape: f32[32,32], index: 4, kind: input, shape index: {}]   ;;  %s2412_s5 = inlined_call_operand.vmem [shape: f32[1,32], index: 5, kind: input, shape index: {}]   ;;  %s2413_s6 = inlined_call_operand.vmem [shape: f32[1,32], index: 6, kind: input, shape index: {}]   ;;  %s2414_s7 = inlined_call_operand.vmem [shape: f32[1,32], index: 7, kind: input, shape index: {}]   ;;  %s2415_s8 = inlined_call_operand.vmem [shape: f32[32,64], index: 8, kind: input, shape index: {}]   ;;  %s2416_s9 = inlined_call_operand.vmem [shape: f32[1,64], index: 9, kind: input, shape index: {}]   ;;  %s2417_s10 = inlined_call_operand.vmem [shape: f32[64,32], index: 10, kind: input, shape index: {}]   ;;  %s2418_s11 = inlined_call_operand.vmem [shape: f32[1,32], index: 11, kind: input, shape index: {}]   ;;  %s2419_s12 = inlined_call_operand.vmem [shape: f32[1,32], index: 12, kind: input, shape index: {}]   ;;  %s2420_s13 = inlined_call_operand.vmem [shape: f32[1,32], index: 13, kind: input, shape index: {}]   ;;  %s2421_s14 = inlined_call_operand.vmem [shape: f32[2,8,32], index: 14, kind: output, shape index: {}]  }
   0x1 LB: > { %s1841_s30 = sadd.s32 4294967295, %s2096_s29   ;;  %p1845_p0 = scmp.ge.s32.totalorder %s2096_s29, 1  ;;  %s2096_s29 = sphi %s2187_s29, %s24_s29  }
   0x2   : > { %p419_p1 = scmp.lt.s32.totalorder %s2096_s29, 3 }
   0x4   : > { %p420_p2 = pnand %p1845_p0, %p419_p1 }
   0x5   : > { %v479_v0 = vld [vmem:[%s2409_s2] sm:$0xff] (!%p420_p2)  ;;  %v480_v1 = vld [vmem:[%s2409_s2 + $0x8] sm:$0xff] (!%p420_p2)  ;;  %v481_v2 = vld [vmem:[%s2409_s2 + $0x10] sm:$0xff] (!%p420_p2)  ;;  %v2098_v3 = vmov (!%p420_p2), 0.0|0.0   ;;  %vm2099_vm0 = vmmov (!%p420_p2), 0   ;;  %v2100_v6 = vmov (!%p420_p2), 0.0  }
   0x6   : > { %423 = sbr.rel (%p420_p2) target bundleno = 3975 (0xf87), region = 76  ;;  %2022 = vmatprep.subr.bf16.mxu0 (!%p420_p2), %v2098_v3  ;;  %v2023_v4 = vpack.c.bf16 (!%p420_p2), %v480_v1, %v479_v0  ;;  %v482_v5 = vld [vmem:[%s2409_s2 + $0x18] sm:$0xff] (!%p420_p2)  ;;  %1929 = vmatprep.mubr.msk.f32.mxu0 (!%p420_p2), %vm2099_vm0, %v2100_v6  ;;  %p466_p3 = scmp.lt.s32.totalorder (!%p420_p2), %s1841_s30, 1  ;;  %vm490_vm1 = vcmask (!%p420_p2), 261120   ;;  %v1848_v9 = vld [vmem:[%s2410_s3] ss:$0 sm:$0xff] (!%p420_p2) }
   0x7   : > { %1937 = vmatprep.subr.mxu1 (!%p420_p2), %v2100_v6  ;;  %1939 = vmatprep.mubr.msk.f32.mxu1 (!%p420_p2), %vm2099_vm0, %v2100_v6  ;;  %v2026_v7 = vpack.c.bf16 (!%p420_p2), %v482_v5, %v481_v2  ;;  %s2101_s15 = smov (!%p420_p2), 64   ;;  %s2102_s16 = smov (!%p420_p2), 96   ;;  %vm579_vm2 = vcmask (!%p420_p2), 64512   ;;  %v564_v26 = vld [vmem:[%s2411_s4] sm:$0xff] (!%p420_p2)  ;;  %v565_v51 = vld [vmem:[%s2411_s4 + $0x8] sm:$0xff] (!%p420_p2)  ;;  %vm1674_vm3 = vcmask (!%p420_p2), 523264  }
   0x8   : > { %2024 = vmatpush3.bf16.msra.mxu0 (!%p420_p2), %v2023_v4  ;;  %s2103_s17 = smov (!%p420_p2), 88   ;;  %s2104_s21 = smov (!%p420_p2), 56   ;;  %v1855_v0 = vld [vmem:[%s2412_s5] ss:$0 sm:$0xff] (!%p420_p2) }
   0x9   : > { %2025 = vmatprep.subr.bf16.mxu0 (!%p420_p2), %v2098_v3  ;;  %s2105_s22 = smov (!%p420_p2), 80   ;;  %s2106_s24 = smov (!%p420_p2), 120  }
   0xa   : > { %s2107_s27 = smov (!%p420_p2), 112   ;;  %s2110_s18 = smov (!%p420_p2), 104  }
   0xc   : > { %2027 = vmatpush3.bf16.msra.mxu0 (!%p420_p2), %v2026_v7 }
   0xd   : > { %s2423_s30 = smov (!%p466_p3, %s1841_s30), 1  ;;  %1932 = vmatprep.subr.mxu0 %v2100_v6 }
   0xe   : > { %s1846_s23 = sshll.u32 %s2423_s30, 3  ;;  %s472_s20 = scalar_lea.vmem %s2408_s1, %s2423_s30 }
   0xf   : > { %s469_s26 = scalar_lea.vmem %s2407_s0, %s1846_s23  ;;  %v2251_v16 = vld [vmem:[%s472_s20] ss:$0 sm:$0xff] }
  0x10   : > { %v2222_v8 = vld [vmem:[%s469_s26] sm:$0xff]  ;;  %s476_s26 = scalar_lea.vmem %s2421_s14, %s1846_s23 }
  0x11   : > { %1930 = vmatmul.mubr.msk.f32.vlgmr.msra.gmra.mrb[0].mxu0 %vm490_vm1, %v2222_v8 }
  0x12   : > { %1934 = vmatprep.mubr.msk.f32.mxu0 %vm2099_vm0, %v2100_v6 }
  0xe4   : > { %v560_v10 = vpop.f32.mrb[0].mxu0 }
  0xe5   : > { %v2232_v11 = vadd.f32 %v1848_v9, %v560_v10  ;;  %v1931_v12 = vpop.f32.mrb[1].mxu0 }
  0xe7   : > { %666 = vrot.lane.b32.xlu1 %v2232_v11, %s2101_s15  ;;  %577 = vrot.lane.b32.xlu0 %v2232_v11, %s2102_s16  ;;  %v2239_v15 = vmul.f32 0.35355338, %v2232_v11  ;;  %s2108_s16 = smov 48  }
  0xeb   : > { %824 = vrot.lane.b32.xlu1 %v2232_v11, %s2103_s17  ;;  %s2109_s17 = smov 72  }
 0x159   : > { %v667_v13 = vpop.permute.xlu1 %666  ;;  %v578_v14 = vpop.permute.xlu0 %577 }
 0x15a   : > { %1933 = vmatpush3.xpose.msk.msra.mxu0 %vm579_vm2, %v578_v14  ;;  %1938 = vmatpush3.msra.mxu1 %v667_v13  ;;  %v566_v14 = vld [vmem:[%s2411_s4 + $0x10] sm:$0xff] }
 0x15b   : > { %1947 = vmatprep.subr.mxu1 %v2100_v6  ;;  %1942 = vmatprep.subr.mxu0 %v2100_v6 }
 0x15d   : > { %1935 = vmatmul.mubr.msk.f32.vlgmr.msra.gmra.mrb[2].mxu0 %vm579_vm2, %v2239_v15  ;;  %v825_v27 = vpop.permute.xlu1 %824 }
 0x15e   : > { %1944 = vmatprep.mubr.msk.f32.mxu0 %vm2099_vm0, %v2100_v6  ;;  %1943 = vmatpush3.msra.mxu0 %v564_v26 }
 0x15f   : > { %1952 = vmatprep.subr.mxu0 %v2100_v6 }
 0x230   : > { %v651_v17 = vpop.f32.mrb[2].mxu0 }
 0x231   : > { %v652_v18 = vadd.f32 %v2251_v16, %v651_v17  ;;  %v1936_v19 = vpop.f32.mrb[3].mxu0 }
 0x233   : > { %v655_v20 = vsel %vm579_vm2, %v652_v18, -inf }
 0x234   : > { %656 = vmax.xlane.f32.xlu0 %v655_v20 }
 0x24a   : > { %911 = vrot.lane.b32.xlu0 %v2232_v11, %s2104_s21 }
 0x24e   : > { %1063 = vrot.lane.b32.xlu0 %v2232_v11, %s2105_s22 }
 0x2c1   : > { %v657_v21 = vpop.xlane.xlu0 %656 }
 0x2c2   : > { %v658_v22 = vsub.f32 %v652_v18, %v657_v21 }
 0x2c4   : > { %v659_v23 = vmul.f32 1.442695, %v658_v22 }
 0x2c5   : > { %v912_v33 = vpop.permute.xlu0 %911 }
 0x2c6   : > { %2068 = vpow2.f32 %v659_v23 }
 0x2c9   : > { %v1064_v46 = vpop.permute.xlu0 %1063 }
 0x2d0   : > { %v2069_v24 = vpop.eup %2068 }
 0x2d1   : > { %v661_v25 = vsel %vm579_vm2, %v2069_v24, 0.0 }
 0x2d2   : > { %662 = vadd.xlane.f32.xlu1 %v661_v25 }
 0x2e3   : > { %822 = vrot.lane.b32.xlu1 %v2239_v15, %s2106_s24  ;;  %s2111_s24 = smov 40  }
 0x35f   : > { %v663_v28 = vpop.xlane.xlu1 %662 }
 0x360   : > { %2070 = vrcp.f32 %v663_v28 }
 0x363   : > { %v823_v31 = vpop.permute.xlu1 %822 }
 0x36a   : > { %v2071_v29 = vpop.eup %2070 }
 0x36b   : > { %v665_v30 = vmul.f32 %v2071_v29, %v2069_v24 }
 0x36d   : > { %1940 = vmatmul.mubr.msk.f32.vlgmr.msra.gmra.mrb[0].mxu1 %vm579_vm2, %v665_v30 }
 0x36e   : > { %1948 = vmatpush3.xpose.msk.msra.mxu1 %vm579_vm2, %v825_v27  ;;  %1949 = vmatprep.mubr.msk.f32.mxu1 %vm2099_vm0, %v2100_v6  ;;  %v567_v27 = vld [vmem:[%s2411_s4 + $0x18] sm:$0xff] }
 0x36f   : > { %1957 = vmatprep.subr.mxu1 %v2100_v6 }
 0x371   : > { %1950 = vmatmul.mubr.msk.f32.vlgmr.msra.gmra.mrb[2].mxu1 %vm579_vm2, %v823_v31 }
 0x372   : > { %1959 = vmatprep.mubr.msk.f32.mxu1 %vm2099_vm0, %v2100_v6  ;;  %1958 = vmatpush3.msra.mxu1 %v565_v51 }
 0x373   : > { %1967 = vmatprep.subr.mxu1 %v2100_v6 }
 0x440   : > { %v738_v32 = vpop.f32.mrb[0].mxu1 }
 0x441   : > { %v1941_v34 = vpop.f32.mrb[1].mxu1  ;;  %1945 = vmatmul.mubr.msk.f32.vlgmr.msra.gmra.mrb[4].mxu0 %vm579_vm2, %v738_v32 }
 0x442   : > { %1953 = vmatpush3.msra.mxu0 %v912_v33  ;;  %1954 = vmatprep.mubr.msk.f32.mxu0 %vm2099_vm0, %v2100_v6 }
 0x443   : > { %1962 = vmatprep.subr.mxu0 %v2100_v6 }
 0x444   : > { %v896_v35 = vpop.f32.mrb[2].mxu1 }
 0x445   : > { %v897_v36 = vadd.f32 %v2251_v16, %v896_v35  ;;  %v1951_v37 = vpop.f32.mrb[3].mxu1 }
 0x447   : > { %v900_v38 = vsel %vm579_vm2, %v897_v36, -inf }
 0x448   : > { %901 = vmax.xlane.f32.xlu1 %v900_v38 }
 0x4d5   : > { %v902_v39 = vpop.xlane.xlu1 %901 }
 0x4d6   : > { %v903_v40 = vsub.f32 %v897_v36, %v902_v39 }
 0x4d8   : > { %v904_v41 = vmul.f32 1.442695, %v903_v40 }
 0x4da   : > { %2072 = vpow2.f32 %v904_v41 }
 0x4e4   : > { %v2073_v42 = vpop.eup %2072 }
 0x4e5   : > { %v906_v43 = vsel %vm579_vm2, %v2073_v42, 0.0 }
 0x4e6   : > { %907 = vadd.xlane.f32.xlu0 %v906_v43 }
 0x4fc   : > { %1061 = vrot.lane.b32.xlu0 %v2239_v15, %s2107_s27 }
 0x514   : > { %v811_v44 = vpop.f32.mrb[4].mxu0 }
 0x515   : > { %v1946_v45 = vpop.f32.mrb[5].mxu0  ;;  %v821_v1 = vadd.f32 %v1855_v0, %v811_v44  ;;  %v1663_v0 = vld [vmem:[%s2417_s10 + $0x20] sm:$0xff] }
 0x516   : > { %v1570_v45 = vld [vmem:[%s2415_s8] sm:$0xff] }
 0x573   : > { %v908_v47 = vpop.xlane.xlu0 %907 }
 0x574   : > { %2074 = vrcp.f32 %v908_v47  ;;  %v1573_v47 = vld [vmem:[%s2415_s8 + $0x18] sm:$0xff] }
 0x577   : > { %v1062_v50 = vpop.permute.xlu0 %1061 }
 0x57e   : > { %v2075_v48 = vpop.eup %2074 }
 0x57f   : > { %v910_v49 = vmul.f32 %v2075_v48, %v2073_v42 }
 0x581   : > { %1955 = vmatmul.mubr.msk.f32.vlgmr.msra.gmra.mrb[6].mxu0 %vm579_vm2, %v910_v49 }
 0x582   : > { %1963 = vmatpush3.xpose.msk.msra.mxu0 %vm579_vm2, %v1064_v46  ;;  %1964 = vmatprep.mubr.msk.f32.mxu0 %vm2099_vm0, %v2100_v6 }
 0x583   : > { %1972 = vmatprep.subr.mxu0 %v2100_v6 }
 0x585   : > { %1965 = vmatmul.mubr.msk.f32.vlgmr.msra.gmra.mrb[8].mxu0 %vm579_vm2, %v1062_v50 }
 0x586   : > { %1974 = vmatprep.mubr.msk.f32.mxu0 %vm2099_vm0, %v2100_v6  ;;  %1973 = vmatpush3.msra.mxu0 %v566_v14 }
 0x587   : > { %1982 = vmatprep.subr.mxu0 %v2100_v6 }
 0x654   : > { %v983_v52 = vpop.f32.mrb[6].mxu0 }
 0x655   : > { %v1956_v53 = vpop.f32.mrb[7].mxu0  ;;  %1960 = vmatmul.mubr.msk.f32.vlgmr.msra.gmra.mrb[4].mxu1 %vm579_vm2, %v983_v52 }
 0x656   : > { %1969 = vmatprep.mubr.msk.f32.mxu1 %vm2099_vm0, %v2100_v6  ;;  %v1868_v53 = vld [vmem:[%s2413_s6] ss:$0 sm:$0xff] }
 0x658   : > { %v1135_v54 = vpop.f32.mrb[8].mxu0 }
 0x659   : > { %v1136_v55 = vadd.f32 %v2251_v16, %v1135_v54  ;;  %v1966_v56 = vpop.f32.mrb[9].mxu0 }
 0x65b   : > { %v1139_v57 = vsel %vm579_vm2, %v1136_v55, -inf }
 0x65c   : > { %1140 = vmax.xlane.f32.xlu1 %v1139_v57 }
 0x66d   : > { %1150 = vrot.lane.b32.xlu1 %v2232_v11, %s2108_s16 }
 0x671   : > { %1302 = vrot.lane.b32.xlu1 %v2232_v11, %s2109_s17 }
 0x675   : > { %1300 = vrot.lane.b32.xlu1 %v2239_v15, %s2110_s18 }
 0x6e9   : > { %v1141_v58 = vpop.xlane.xlu1 %1140 }
 0x6ea   : > { %v1142_v59 = vsub.f32 %v1136_v55, %v1141_v58  ;;  %v1869_v55 = vld [vmem:[%s2414_s7] ss:$0 sm:$0xff] }
 0x6eb   : > { %v1659_v58 = vld [vmem:[%s2417_s10] sm:$0xff] }
 0x6ec   : > { %v1143_v60 = vmul.f32 1.442695, %v1142_v59  ;;  %v1660_v59 = vld [vmem:[%s2417_s10 + $0x8] sm:$0xff] }
 0x6ed   : > { %v1151_v61 = vpop.permute.xlu1 %1150 }
 0x6ee   : > { %2076 = vpow2.f32 %v1143_v60  ;;  %1968 = vmatpush3.msra.mxu1 %v1151_v61  ;;  %v2035_v60 = vpack.c.bf16 %v1660_v59, %v1659_v58  ;;  %v1661_v61 = vld [vmem:[%s2417_s10 + $0x10] sm:$0xff] }
 0x6ef   : > { %1977 = vmatprep.subr.mxu1 %v2100_v6 }
 0x6f1   : > { %v1303_v10 = vpop.permute.xlu1 %1302 }
 0x6f5   : > { %v1301_v13 = vpop.permute.xlu1 %1300 }
 0x6f8   : > { %v2077_v62 = vpop.eup %2076 }
 0x6f9   : > { %v1145_v63 = vsel %vm579_vm2, %v2077_v62, 0.0 }
 0x6fa   : > { %1146 = vadd.xlane.f32.xlu0 %v1145_v63 }
 0x728   : > { %v1056_v2 = vpop.f32.mrb[4].mxu1 }
 0x729   : > { %v1060_v4 = vadd.f32 %v1056_v2, %v821_v1  ;;  %v1961_v5 = vpop.f32.mrb[5].mxu1  ;;  %v1664_v1 = vld [vmem:[%s2417_s10 + $0x28] sm:$0xff] }
 0x72a   : > { %v2041_v2 = vpack.c.bf16 %v1664_v1, %v1663_v0  ;;  %v1666_v5 = vld [vmem:[%s2417_s10 + $0x38] sm:$0xff] }
 0x787   : > { %v1147_v7 = vpop.xlane.xlu0 %1146 }
 0x788   : > { %2078 = vrcp.f32 %v1147_v7 }
 0x792   : > { %v2079_v9 = vpop.eup %2078 }
 0x793   : > { %v1149_v12 = vmul.f32 %v2079_v9, %v2077_v62  ;;  %v1662_v62 = vld [vmem:[%s2417_s10 + $0x18] sm:$0xff]  ;;  %v1870_v9 = vld [vmem:[%s2416_s9] ss:$0 sm:$0xff] }
 0x794   : > { %v2038_v63 = vpack.c.bf16 %v1662_v62, %v1661_v61 }
 0x795   : > { %1970 = vmatmul.mubr.msk.f32.vlgmr.msra.gmra.mrb[6].mxu1 %vm579_vm2, %v1149_v12 }
 0x796   : > { %1978 = vmatpush3.xpose.msk.msra.mxu1 %vm579_vm2, %v1303_v10  ;;  %1979 = vmatprep.mubr.msk.f32.mxu1 %vm2099_vm0, %v2100_v6 }
 0x797   : > { %1987 = vmatprep.subr.mxu1 %v2100_v6 }
 0x799   : > { %1980 = vmatmul.mubr.msk.f32.vlgmr.msra.gmra.mrb[8].mxu1 %vm579_vm2, %v1301_v13 }
 0x79a   : > { %1989 = vmatprep.mubr.msk.f32.mxu1 %vm2099_vm0, %v2100_v6  ;;  %1988 = vmatpush3.msra.mxu1 %v567_v27 }
 0x79b   : > { %2034 = vmatprep.subr.bf16.mxu1 %v2098_v3 }
 0x868   : > { %v1222_v15 = vpop.f32.mrb[6].mxu1 }
 0x869   : > { %v1971_v17 = vpop.f32.mrb[7].mxu1  ;;  %1975 = vmatmul.mubr.msk.f32.vlgmr.msra.gmra.mrb[10].mxu0 %vm579_vm2, %v1222_v15 }
 0x86a   : > { %1984 = vmatprep.mubr.msk.f32.mxu0 %vm2099_vm0, %v2100_v6 }
 0x86c   : > { %v1374_v18 = vpop.f32.mrb[8].mxu1 }
 0x86d   : > { %v1375_v19 = vadd.f32 %v2251_v16, %v1374_v18  ;;  %v1981_v20 = vpop.f32.mrb[9].mxu1 }
 0x86f   : > { %v1378_v21 = vsel %vm579_vm2, %v1375_v19, -inf }
 0x870   : > { %1379 = vmax.xlane.f32.xlu1 %v1378_v21 }
 0x8fd   : > { %v1380_v22 = vpop.xlane.xlu1 %1379 }
 0x8fe   : > { %v1381_v23 = vsub.f32 %v1375_v19, %v1380_v22  ;;  %v1872_v19 = vld [vmem:[%s2418_s11] ss:$0 sm:$0xff] }
 0x900   : > { %v1382_v24 = vmul.f32 1.442695, %v1381_v23 }
 0x902   : > { %2080 = vpow2.f32 %v1382_v24 }
 0x90c   : > { %v2081_v25 = vpop.eup %2080 }
 0x90d   : > { %v1384_v26 = vsel %vm579_vm2, %v2081_v25, 0.0 }
 0x90e   : > { %1385 = vadd.xlane.f32.xlu0 %v1384_v26 }
 0x924   : > { %1389 = vrot.lane.b32.xlu0 %v2232_v11, %s2111_s24 }
 0x93c   : > { %v1295_v16 = vpop.f32.mrb[10].mxu0 }
 0x93d   : > { %v1299_v28 = vadd.f32 %v1295_v16, %v1060_v4  ;;  %v1976_v29 = vpop.f32.mrb[11].mxu0  ;;  %v1665_v4 = vld [vmem:[%s2417_s10 + $0x30] sm:$0xff] }
 0x93e   : > { %v2044_v7 = vpack.c.bf16 %v1666_v5, %v1665_v4 }
 0x99b   : > { %v1386_v30 = vpop.xlane.xlu0 %1385 }
 0x99c   : > { %2082 = vrcp.f32 %v1386_v30 }
 0x99f   : > { %v1390_v31 = vpop.permute.xlu0 %1389 }
 0x9a0   : > { %1983 = vmatpush3.msra.mxu0 %v1390_v31 }
 0x9a1   : > { %2028 = vmatprep.subr.bf16.mxu0 %v2098_v3 }
 0x9a6   : > { %v2083_v32 = vpop.eup %2082 }
 0x9a7   : > { %v1388_v33 = vmul.f32 %v2083_v32, %v2081_v25 }
 0x9a9   : > { %1985 = vmatmul.mubr.msk.f32.vlgmr.msra.gmra.mrb[12].mxu0 %vm579_vm2, %v1388_v33  ;;  %v1874_v33 = vld [vmem:[%s2419_s12] ss:$0 sm:$0xff] }
 0x9aa   : > { %2000 = vmatprep.mubr.msk.f32.mxu0 %vm2099_vm0, %v2100_v6 }
 0xa7c   : > { %v1461_v11 = vpop.f32.mrb[12].mxu0 }
 0xa7d   : > { %v1986_v34 = vpop.f32.mrb[13].mxu0  ;;  %1990 = vmatmul.mubr.msk.f32.vlgmr.msra.gmra.mrb[10].mxu1 %vm579_vm2, %v1461_v11 }
 0xa7e   : > { %2019 = vmatprep.mubr.msk.f32.mxu1 %vm2099_vm0, %v2100_v6  ;;  %v1571_v6 = vld [vmem:[%s2415_s8 + $0x8] sm:$0xff]  ;;  %2036 = vmatpush3.bf16.msra.mxu1 %v2035_v60  ;;  %v1875_v34 = vld [vmem:[%s2420_s13] ss:$0 sm:$0xff] }
 0xa7f   : > { %v2029_v46 = vpack.c.bf16 %v1571_v6, %v1570_v45  ;;  %2037 = vmatprep.subr.bf16.mxu1 %v2098_v3 }
 0xa81   : > { %2030 = vmatpush3.bf16.msra.mxu0 %v2029_v46 }
 0xa82   : > { %2031 = vmatprep.subr.bf16.mxu0 %v2098_v3  ;;  %2039 = vmatpush3.bf16.msra.mxu1 %v2038_v63 }
 0xa83   : > { %2040 = vmatprep.subr.bf16.mxu1 %v2098_v3 }
 0xa86   : > { %2042 = vmatpush3.bf16.msra.mxu1 %v2041_v2 }
 0xa87   : > { %2043 = vmatprep.subr.bf16.mxu1 %v2098_v3 }
 0xa8a   : > { %2045 = vmatpush3.bf16.msra.mxu1 %v2044_v7 }
 0xb50   : > { %v1534_v35 = vpop.f32.mrb[10].mxu1 }
 0xb51   : > { %v1538_v36 = vadd.f32 %v1534_v35, %v1299_v28  ;;  %v1991_v37 = vpop.f32.mrb[11].mxu1 }
 0xb53   : > { %v1539_v38 = vadd.f32 %v1538_v36, %v2222_v8  ;;  %v1572_v8 = vld [vmem:[%s2415_s8 + $0x10] sm:$0xff] }
 0xb54   : > { %v2032_v48 = vpack.c.bf16 %v1573_v47, %v1572_v8 }
 0xb55   : > { %v1542_v39 = vsel %vm490_vm1, %v1539_v38, 0.0 }
 0xb56   : > { %1543 = vadd.xlane.f32.xlu0 %v1542_v39  ;;  %2033 = vmatpush3.bf16.msra.mxu0 %v2032_v48 }
 0xbe3   : > { %v1544_v40 = vpop.xlane.xlu0 %1543 }
 0xbe4   : > { %v1546_v41 = vmul.f32 0.03125, %v1544_v40 }
 0xbe6   : > { %v1547_v42 = vsub.f32 %v1539_v38, %v1546_v41 }
 0xbe8   : > { %v1548_v43 = vmul.f32 %v1547_v42, %v1547_v42 }
 0xbea   : > { %v1549_v44 = vsel %vm490_vm1, %v1548_v43, 0.0 }
 0xbeb   : > { %1550 = vadd.xlane.f32.xlu1 %v1549_v44 }
 0xc78   : > { %v1551_v49 = vpop.xlane.xlu1 %1550 }
 0xc79   : > { %v1552_v50 = vmul.f32 0.03125, %v1551_v49 }
 0xc7b   : > { %v1553_v51 = vadd.f32 1e-05, %v1552_v50 }
 0xc7d   : > { %2084 = vrsqrt.f32 %v1553_v51 }
 0xc87   : > { %v2085_v52 = vpop.eup %2084 }
 0xc88   : > { %v1555_v54 = vmul.f32 %v2085_v52, %v1547_v42 }
 0xc8a   : > { %v1562_v56 = vmul.f32 %v1868_v53, %v1555_v54 }
 0xc8c   : > { %v1569_v57 = vadd.f32 %v1869_v55, %v1562_v56 }
 0xc8e   : > { %2001 = vmatmul.mubr.msk.f32.vlgmr.msra.gmra.mrb[14].mxu0 %vm490_vm1, %v1569_v57 }
 0xd61   : > { %v1650_v10 = vpop.f32.mrb[14].mxu0 }
 0xd62   : > { %v1651_v12 = vadd.f32 %v1870_v9, %v1650_v10  ;;  %v2002_v13 = vpop.f32.mrb[15].mxu0 }
 0xd64   : > { %v1655_v14 = vmul.f32 0.70710677, %v1651_v12  ;;  %v1654_v15 = vmul.f32 0.5, %v1651_v12 }
 0xd66   : > { %2086 = verf.f32 %v1655_v14 }
 0xd70   : > { %v2087_v3 = vpop.eup %2086 }
 0xd71   : > { %v1657_v17 = vadd.f32 1.0, %v2087_v3 }
 0xd73   : > { %v1658_v18 = vmul.f32 %v1657_v17, %v1654_v15 }
 0xd75   : > { %2020 = vmatmul.mubr.msk.f32.vlgmr.msra.gmra.mrb[12].mxu1 %vm1674_vm3, %v1658_v18 }
 0xe48   : > { %v1744_v20 = vpop.f32.mrb[12].mxu1 }
 0xe49   : > { %v1745_v21 = vadd.f32 %v1872_v19, %v1744_v20  ;;  %v2021_v22 = vpop.f32.mrb[13].mxu1 }
 0xe4b   : > { %v1748_v23 = vadd.f32 %v1745_v21, %v1569_v57 }
 0xe4d   : > { %v1751_v24 = vsel %vm490_vm1, %v1748_v23, 0.0 }
 0xe4e   : > { %1752 = vadd.xlane.f32.xlu1 %v1751_v24 }
 0xedb   : > { %v1753_v25 = vpop.xlane.xlu1 %1752 }
 0xedc   : > { %v1754_v26 = vmul.f32 0.03125, %v1753_v25 }
 0xede   : > { %v1755_v27 = vsub.f32 %v1748_v23, %v1754_v26 }
 0xee0   : > { %v1756_v16 = vmul.f32 %v1755_v27, %v1755_v27 }
 0xee2   : > { %v1757_v28 = vsel %vm490_vm1, %v1756_v16, 0.0 }
 0xee3   : > { %1758 = vadd.xlane.f32.xlu1 %v1757_v28 }
 0xf70   : > { %v1759_v29 = vpop.xlane.xlu1 %1758 }
 0xf71   : > { %v1760_v30 = vmul.f32 0.03125, %v1759_v29 }
 0xf73   : > { %v1761_v31 = vadd.f32 1e-05, %v1760_v30 }
 0xf75   : > { %2088 = vrsqrt.f32 %v1761_v31 }
 0xf7f   : > { %v2089_v32 = vpop.eup %2088 }
 0xf80   : > { %v1763_v11 = vmul.f32 %v2089_v32, %v1755_v27 }
 0xf82   : > { %v1770_v35 = vmul.f32 %v1874_v33, %v1763_v11 }
 0xf84   : > { %v1777_v36 = vadd.f32 %v1875_v34, %v1770_v35 }
 0xf86   : > { %1778 = vst.msk [vmem:[%s476_s26] sm:$0xff] %vm490_vm1, %v1777_v36 }
 0xf87 PF: > { %s24_s29 = sadd.s32 1, %s2096_s29  }
 0xf88   : > { %p21_p4 = scmp.ge.s32.totalorder %s24_s29, 4  }
 0xf8a   :  { %23 = sbr.rel (!%p21_p4) target bundleno = 1 (0x1), region = 109 }

</bundles_post_ra>
